<compile_context>
chip_gen: v7x
topology: tpu7x:2x2x1
jax: 0.10.0
libtpu: 0.0.40
codegen_flags: <defaults>
</compile_context>

<pallas_src>
import jax
import jax.numpy as jnp
from jax.experimental import pallas as pl
from jax.experimental.pallas import tpu as pltpu

_LANE = 128  # TPU lane width; batch tiles are lane-aligned for the output row.


def _round_up(n, m):
    return ((n + m - 1) // m) * m


def _critic_kernel(xu_ref, w1_ref, b1_ref, w2_ref, b2_ref, w3_ref, b3_ref,
                   out_ref):
    # ---- layer 1: h1 = relu(cat(x,u) @ W1 + b1)   (bf16 inputs off DMA, f32 acc)
    h1 = jnp.dot(xu_ref[...], w1_ref[...], preferred_element_type=jnp.float32)
    h1 = jnp.maximum(h1 + b1_ref[...], 0.0)          # f32 VPU (v5e-safe)

    # ---- layer 2: h2 = relu(h1 @ W2 + b2)   -- the MXU-bound layer, bf16 fed
    h2 = jnp.dot(h1.astype(jnp.bfloat16), w2_ref[...],
                 preferred_element_type=jnp.float32)
    h2 = jnp.maximum(h2 + b2_ref[...], 0.0)

    # ---- layer 3: N=1 matmul as VPU multiply + XLU lane reduction, then a
    #      lane-dense (1, TB) store (batch along lanes -> unmasked vst).
    q = jnp.sum(h2 * w3_ref[...], axis=-1) + b3_ref[0, 0]
    out_ref[...] = q[None, :].astype(out_ref.dtype)


def critic_forward(x, u, params, *, block_b=4096):
    """x: (B, state_dim) f32, u: (B, action_dim) f32 -> q: (B, 1) f32."""
    w1, b1, w2, b2, w3, b3 = params
    B, state_dim = x.shape
    action_dim = u.shape[1]
    in_dim = state_dim + action_dim
    hidden = w2.shape[0]

    # cat + bf16 cast in the wrapper: a trivial (B, 16) op that lets layer 1 be
    # a single bf16 MXU matmul and halves the streamed input bytes.
    xu = jnp.concatenate([x, u], axis=1).astype(jnp.bfloat16)

    # Batch tiling: lane-aligned tile, capped at ceil(B/2) so the grid has at
    # least 2 steps whenever possible (both v7x TensorCores get work), and at
    # block_b so per-step VMEM stays well inside 48 MiB on every generation.
    half = _round_up((B + 1) // 2, _LANE)
    TB = max(_LANE, min(block_b, half))
    B_pad = _round_up(B, TB)
    if B_pad != B:
        xu = jnp.pad(xu, ((0, B_pad - B), (0, 0)))
    grid = (B_pad // TB,)

    # Weights feeding the MXU are stored bf16 (accumulation stays f32);
    # layer-3 row and all biases stay f32 for the VPU epilogue.
    w1b = w1.astype(jnp.bfloat16)
    w2b = w2.astype(jnp.bfloat16)
    w3r = w3.reshape(1, hidden)
    b3s = b3.reshape(1, 1)                 # scalar -> SMEM

    resident = lambda shape: pl.BlockSpec(shape, lambda i: (0, 0))

    flops = 2 * B_pad * (in_dim * hidden + hidden * hidden + hidden)
    bytes_accessed = (xu.size * 2                                 # bf16 inputs
                      + (w1b.size + w2b.size) * 2                 # bf16 weights
                      + (b1.size + b2.size + w3r.size + 1) * 4    # f32 biases / w3
                      + B_pad * 4)                                # f32 output

    out = pl.pallas_call(
        _critic_kernel,
        out_shape=jax.ShapeDtypeStruct((B_pad // TB, TB), jnp.float32),
        grid=grid,
        in_specs=[
            pl.BlockSpec((TB, in_dim), lambda i: (i, 0)),  # cat(x,u), streamed
            resident(w1b.shape),                           # W1 (resident)
            resident(b1.shape),                            # b1
            resident(w2b.shape),                           # W2
            resident(b2.shape),                            # b2
            resident(w3r.shape),                           # W3 as (1, 256)
            pl.BlockSpec(memory_space=pltpu.SMEM),         # b3 scalar
        ],
        # Lane-dense output: one (1, TB) row per grid step.
        out_specs=pl.BlockSpec((1, TB), lambda i: (i, 0)),
        compiler_params=pltpu.CompilerParams(
            dimension_semantics=("parallel",),
            vmem_limit_bytes=48 * 1024 * 1024),
        cost_estimate=pl.CostEstimate(flops=flops, transcendentals=0,
                                      bytes_accessed=bytes_accessed),
    )(xu, w1b, b1, w2b, b2, w3r, b3s)

    # (num_tiles, TB) lane-major -> (B, 1) column, dropping batch padding.
    return out.reshape(B_pad)[:B].reshape(B, 1)


def init_critic_params(key, state_dim, action_dim, hidden=256):
    """Deterministic init matching the module's shapes (stored as (in, out))."""
    in_dim = state_dim + action_dim
    k1, k2, k3, k4, k5, k6 = jax.random.split(key, 6)

    def uniform_fan_in(k, shape, fan_in):
        bound = 1.0 / jnp.sqrt(jnp.float32(fan_in))
        return jax.random.uniform(k, shape, jnp.float32, -bound, bound)

    w1 = uniform_fan_in(k1, (in_dim, hidden), in_dim)
    b1 = uniform_fan_in(k2, (1, hidden), in_dim)
    w2 = uniform_fan_in(k3, (hidden, hidden), hidden)
    b2 = uniform_fan_in(k4, (1, hidden), hidden)
    w3 = uniform_fan_in(k5, (hidden, 1), hidden)
    b3 = uniform_fan_in(k6, (1, 1), hidden)
    return (w1, b1, w2, b2, w3, b3)


def _reference(x, u, params):
    """Plain-JAX reference with the same bf16-at-MXU casts as the kernel."""
    w1, b1, w2, b2, w3, b3 = params
    xu = jnp.concatenate([x, u], axis=1).astype(jnp.bfloat16)
    h = jnp.dot(xu, w1.astype(jnp.bfloat16),
                preferred_element_type=jnp.float32)
    h = jnp.maximum(h + b1, 0.0)
    h = jnp.dot(h.astype(jnp.bfloat16), w2.astype(jnp.bfloat16),
                preferred_element_type=jnp.float32)
    h = jnp.maximum(h + b2, 0.0)
    return jnp.dot(h, w3, preferred_element_type=jnp.float32) + b3


if __name__ == "__main__":
    key = jax.random.PRNGKey(0)
    k_params, k_x, k_u, k_x2, k_u2 = jax.random.split(key, 5)

    state_dim, action_dim = 12, 4
    params = init_critic_params(k_params, state_dim, action_dim)

    # Small shape (single batch tile).
    batch = 8
    x = jax.random.normal(k_x, (batch, state_dim), jnp.float32)
    u = jax.random.normal(k_u, (batch, action_dim), jnp.float32)
    q = critic_forward(x, u, params)
    jax.block_until_ready(q)
    q_ref = _reference(x, u, params)
    assert q.shape == (batch, 1)
    assert jnp.allclose(q, q_ref, atol=1e-2, rtol=1e-2), \
        float(jnp.max(jnp.abs(q - q_ref)))

    # Larger, non-aligned batch exercises the multi-tile grid + padding path
    # (TB = 512, grid = 2, so the v7x two-TC sharding path is also covered).
    batch2 = 1000
    x2 = jax.random.normal(k_x2, (batch2, state_dim), jnp.float32)
    u2 = jax.random.normal(k_u2, (batch2, action_dim), jnp.float32)
    q2 = critic_forward(x2, u2, params)
    jax.block_until_ready(q2)
    q2_ref = _reference(x2, u2, params)
    assert q2.shape == (batch2, 1)
    assert jnp.allclose(q2, q2_ref, atol=1e-2, rtol=1e-2), \
        float(jnp.max(jnp.abs(q2 - q2_ref)))

    print("KERNEL_OK")
</pallas_src>

<mosaic_0001>
module attributes {stable_mosaic.version = 11 : i64} {
  func.func @_critic_kernel(%arg0: i32, %arg1: memref<128x16xbf16, #tpu.memory_space<vmem>>, %arg2: memref<16x256xbf16, #tpu.memory_space<vmem>>, %arg3: memref<1x256xf32, #tpu.memory_space<vmem>>, %arg4: memref<256x256xbf16, #tpu.memory_space<vmem>>, %arg5: memref<1x256xf32, #tpu.memory_space<vmem>>, %arg6: memref<1x256xf32, #tpu.memory_space<vmem>>, %arg7: memref<1x1xf32, #tpu.memory_space<smem>>, %arg8: memref<1x128xf32, #tpu.memory_space<vmem>>) attributes {dimension_semantics = [#tpu.dimension_semantics<parallel>], iteration_bounds = array<i64: 1>, scalar_prefetch = 0 : i64, scratch_operands = 0 : i64, tpu.core_type = #tpu.core_type<tc>, window_params = [{transform_indices = @transform_0, window_bounds = array<i64: 128, 16>}, {pipeline_mode = #tpu.pipeline_mode<synchronous>, transform_indices = @transform_1, window_bounds = array<i64: 16, 256>}, {pipeline_mode = #tpu.pipeline_mode<synchronous>, transform_indices = @transform_2, window_bounds = array<i64: 1, 256>}, {pipeline_mode = #tpu.pipeline_mode<synchronous>, transform_indices = @transform_3, window_bounds = array<i64: 256, 256>}, {pipeline_mode = #tpu.pipeline_mode<synchronous>, transform_indices = @transform_4, window_bounds = array<i64: 1, 256>}, {pipeline_mode = #tpu.pipeline_mode<synchronous>, transform_indices = @transform_5, window_bounds = array<i64: 1, 256>}, {transform_indices = @transform_6, window_bounds = array<i64: 1, 1>}, {transform_indices = @transform_7, window_bounds = array<i64: 1, 128>}]} {
    %c0 = arith.constant 0 : index
    %c0_0 = arith.constant 0 : index
    %0 = vector.load %arg1[%c0, %c0_0] : memref<128x16xbf16, #tpu.memory_space<vmem>>, vector<128x16xbf16>
    %c0_1 = arith.constant 0 : index
    %c0_2 = arith.constant 0 : index
    %1 = vector.load %arg2[%c0_1, %c0_2] : memref<16x256xbf16, #tpu.memory_space<vmem>>, vector<16x256xbf16>
    %cst = arith.constant dense<0.000000e+00> : vector<128x256xf32>
    %2 = tpu.matmul %0, %1, %cst {dimension_numbers = #tpu.dot_dimension_numbers<[1], [0], [0], [1], [0, 0, 1, 1], [], []>} : vector<128x16xbf16>, vector<16x256xbf16>, vector<128x256xf32> -> vector<128x256xf32>
    %c0_3 = arith.constant 0 : index
    %c0_4 = arith.constant 0 : index
    %3 = vector.load %arg3[%c0_3, %c0_4] : memref<1x256xf32, #tpu.memory_space<vmem>>, vector<1x256xf32>
    %4 = vector.broadcast %3 : vector<1x256xf32> to vector<128x256xf32>
    %5 = arith.addf %2, %4 : vector<128x256xf32>
    %cst_5 = arith.constant 0.000000e+00 : f32
    %6 = vector.broadcast %cst_5 : f32 to vector<128x256xf32>
    %7 = arith.maximumf %5, %6 : vector<128x256xf32>
    %8 = arith.truncf %7 : vector<128x256xf32> to vector<128x256xbf16>
    %c0_6 = arith.constant 0 : index
    %c0_7 = arith.constant 0 : index
    %9 = vector.load %arg4[%c0_6, %c0_7] : memref<256x256xbf16, #tpu.memory_space<vmem>>, vector<256x256xbf16>
    %cst_8 = arith.constant dense<0.000000e+00> : vector<128x256xf32>
    %10 = tpu.matmul %8, %9, %cst_8 {dimension_numbers = #tpu.dot_dimension_numbers<[1], [0], [0], [1], [0, 0, 1, 1], [], []>} : vector<128x256xbf16>, vector<256x256xbf16>, vector<128x256xf32> -> vector<128x256xf32>
    %c0_9 = arith.constant 0 : index
    %c0_10 = arith.constant 0 : index
    %11 = vector.load %arg5[%c0_9, %c0_10] : memref<1x256xf32, #tpu.memory_space<vmem>>, vector<1x256xf32>
    %12 = vector.broadcast %11 : vector<1x256xf32> to vector<128x256xf32>
    %13 = arith.addf %10, %12 : vector<128x256xf32>
    %cst_11 = arith.constant 0.000000e+00 : f32
    %14 = vector.broadcast %cst_11 : f32 to vector<128x256xf32>
    %15 = arith.maximumf %13, %14 : vector<128x256xf32>
    %c0_12 = arith.constant 0 : index
    %c0_13 = arith.constant 0 : index
    %16 = vector.load %arg6[%c0_12, %c0_13] : memref<1x256xf32, #tpu.memory_space<vmem>>, vector<1x256xf32>
    %17 = vector.broadcast %16 : vector<1x256xf32> to vector<128x256xf32>
    %18 = arith.mulf %15, %17 : vector<128x256xf32>
    %cst_14 = arith.constant dense<0.000000e+00> : vector<128xf32>
    %19 = vector.multi_reduction <add>, %18, %cst_14 [1] : vector<128x256xf32> to vector<128xf32>
    %c0_15 = arith.constant 0 : index
    %c0_16 = arith.constant 0 : index
    %20 = memref.load %arg7[%c0_15, %c0_16] : memref<1x1xf32, #tpu.memory_space<smem>>
    %21 = vector.broadcast %20 : f32 to vector<128xf32>
    %22 = arith.addf %19, %21 : vector<128xf32>
    %23 = vector.shape_cast %22 : vector<128xf32> to vector<1x128xf32>
    %c0_17 = arith.constant 0 : index
    %c0_18 = arith.constant 0 : index
    %24 = vector.load %arg8[%c0_17, %c0_18] : memref<1x128xf32, #tpu.memory_space<vmem>>, vector<1x128xf32>
    tpu.vector_store %arg8[%c0_17, %c0_18], %23 {strides = array<i32>} : memref<1x128xf32, #tpu.memory_space<vmem>>, vector<1x128xf32>,
    return
  }
  func.func @transform_0(%arg0: i32) -> (i32, i32) {
    %c0_i32 = arith.constant 0 : i32
    %c0_i32_0 = arith.constant 0 : i32
    return %arg0, %c0_i32 : i32, i32
  }
  func.func @transform_1(%arg0: i32) -> (i32, i32) {
    %c0_i32 = arith.constant 0 : i32
    %c0_i32_0 = arith.constant 0 : i32
    %c0_i32_1 = arith.constant 0 : i32
    return %c0_i32, %c0_i32_0 : i32, i32
  }
  func.func @transform_2(%arg0: i32) -> (i32, i32) {
    %c0_i32 = arith.constant 0 : i32
    %c0_i32_0 = arith.constant 0 : i32
    %c0_i32_1 = arith.constant 0 : i32
    return %c0_i32, %c0_i32_0 : i32, i32
  }
  func.func @transform_3(%arg0: i32) -> (i32, i32) {
    %c0_i32 = arith.constant 0 : i32
    %c0_i32_0 = arith.constant 0 : i32
    %c0_i32_1 = arith.constant 0 : i32
    return %c0_i32, %c0_i32_0 : i32, i32
  }
  func.func @transform_4(%arg0: i32) -> (i32, i32) {
    %c0_i32 = arith.constant 0 : i32
    %c0_i32_0 = arith.constant 0 : i32
    %c0_i32_1 = arith.constant 0 : i32
    return %c0_i32, %c0_i32_0 : i32, i32
  }
  func.func @transform_5(%arg0: i32) -> (i32, i32) {
    %c0_i32 = arith.constant 0 : i32
    %c0_i32_0 = arith.constant 0 : i32
    %c0_i32_1 = arith.constant 0 : i32
    return %c0_i32, %c0_i32_0 : i32, i32
  }
  func.func @transform_6(%arg0: i32) -> (i32, i32) {
    %c0_i32 = arith.constant 0 : i32
    %c0_i32_0 = arith.constant 0 : i32
    %c0_i32_1 = arith.constant 0 : i32
    return %c0_i32, %c0_i32_0 : i32, i32
  }
  func.func @transform_7(%arg0: i32) -> (i32, i32) {
    %c0_i32 = arith.constant 0 : i32
    %c0_i32_0 = arith.constant 0 : i32
    return %arg0, %c0_i32 : i32, i32
  }
}

</mosaic_0001>

<bundles_post_ra>
// kernel: tpu_custom_call.1
= control target key start
LH: loop header
LB: loop body
LE: loop exit
PB: predicated region body
PF: predicated region fallthrough
CT: control target
= control target key end

     0   :  { %13 = vsyncpa [#allocation4], 0  ;;  %s1413_s0 = inlined_call_operand.vmem [shape: bf16[128,16], index: 0, kind: input, shape index: {}]   ;;  %s1414_s1 = inlined_call_operand.vmem [shape: bf16[16,256], index: 1, kind: input, shape index: {}]   ;;  %s1415_s2 = inlined_call_operand.vmem [shape: f32[1,256], index: 2, kind: input, shape index: {}]   ;;  %s1416_s3 = inlined_call_operand.hbm [shape: bf16[256,256], index: 3, kind: input, shape index: {}]   ;;  %s1417_s4 = inlined_call_operand.vmem [shape: f32[1,256], index: 4, kind: input, shape index: {}]   ;;  %s1418_s5 = inlined_call_operand.vmem [shape: f32[1,256], index: 5, kind: input, shape index: {}]   ;;  %s1419_s6 = inlined_call_operand.<no memory space> [shape: f32[1,1], index: 6, kind: input, shape index: {}]   ;;  %s1420_s7 = inlined_call_operand.hbm [shape: f32[1,128], index: 7, kind: output, shape index: {}]  }
   0x1   :  { %14 = vsyncpa [#allocation5], 0  ;;  %s1106_s24 = smov [#allocation3]   ;;  %s1058_s28 = scalar_lea.hbm %s1416_s3, 4096 }
   0x2   :  { %s26_s25 = sshll.u32 %s1106_s24, 4  ;;  %p1059_p0 = scmp.ne.s32.totalorder %s1416_s3, %s1058_s28  ;;  %s27_s25 = int_to_ptr.vmem [resolvable:$true] %s26_s25 }
   0x3   :  { %p1062_p1 = scmp.lt.u32.totalorder %s1058_s28, %s1416_s3 }
   0x5   :  { %p1064_p2 = pnand %p1062_p1, %p1059_p0 }
   0x7   :  { %1067 = shalt.err (!%p1064_p2)
}
   0x8   :  { %s1068_s10 = scalar_lea.vmem %s27_s25, 4096  ;;  %p1073_p4 = scmp.lt.s32.totalorder %s27_s25, %s27_s25 }
   0x9   :  { %p1069_p3 = scmp.ne.s32.totalorder %s27_s25, %s1068_s10  ;;  %p1074_p5 = scmp.lt.s32.totalorder %s1068_s10, %s1068_s10 }
   0xb   :  { %p1075_p6 = por %p1074_p5, %p1073_p4 }
   0xd   :  { %p1076_p7 = pnand %p1075_p6, %p1069_p3 }
   0xf   :  { %1079 = shalt.err (!%p1076_p7)
}
  0x10   :  { %s1107_s11 = smov 128   ;;  %s1108_s12 = smov 8  }
  0x11   :  { %32 = dma.hbm_to_vmem [thread:$0]  %s1416_s3, 4096, %s27_s25, [#allocation4], %s1107_s11, %s1107_s11, %s1108_s12  }
  0x12   :  { %1102 = dma.done.wait [#allocation4], 4096  }
  0x13   :  { %1103 = vsyncadd [#allocation4], 4294963200  ;;  %v1109_v0 = vmov 0   ;;  %v999_v1 = vld [vmem:[%s1414_s1 + $0x4] ss:$8 sps:$4 sm:$0xff]   ;;  %vm123_vm0 = vcmask 130048   ;;  %v63_v43 = vlaneseq }
  0x14   :  { %180 = vmatprep.mubr.bf16.mxu0 %v1109_v0  ;;  %v1001_v2 = vld [vmem:[%s1414_s1] ss:$8 sps:$4 sm:$0xff]   ;;  %148 = vmatprep.subr.bf16.mxu0 %v999_v1  ;;  %v1012_v6 = vld [vmem:[#allocation3 + $0x4] ss:$8 sps:$4 sm:$0xff]   ;;  %v1015_v7 = vld [vmem:[#allocation3 + $0x14] ss:$8 sps:$4 sm:$0xff]  }
  0x15   :  { %v1002_v3 = vld [vmem:[%s1413_s0] sm:$0xff]   ;;  %149 = vmatpush1.bf16.msra.mxu0 %v1001_v2  ;;  %v1003_v4 = vld [vmem:[%s1413_s0 + $0x8] sm:$0xff]   ;;  %962 = vmatprep.subr.bf16.mxu1 %v1012_v6  ;;  %v1013_v8 = vld [vmem:[#allocation3 + $0x10] ss:$8 sps:$4 sm:$0xff]   ;;  %v1210_v44 = vshrl.u32 %v63_v43, 7  ;;  %vm795_vm1 = vcmask 130112  }
  0x16   :  { %v1010_v5 = vld [vmem:[#allocation3] ss:$8 sps:$4 sm:$0xff]   ;;  %513 = vmatprep.subr.bf16.mxu0 %v1012_v6  ;;  %v1018_v9 = vld [vmem:[#allocation3 + $0x24] ss:$8 sps:$4 sm:$0xff]   ;;  %v1004_v11 = vld [vmem:[%s1413_s0 + $0x10] sm:$0xff]   ;;  %vm802_vm2 = vcmask 195712  }
  0x17   :  { %978 = vmatpush1.bf16.msra.mxu1 %v1010_v5  ;;  %v1016_v10 = vld [vmem:[#allocation3 + $0x20] ss:$8 sps:$4 sm:$0xff]   ;;  %v1021_v12 = vld [vmem:[#allocation3 + $0x34] ss:$8 sps:$4 sm:$0xff]   ;;  %v1019_v13 = vld [vmem:[#allocation3 + $0x30] ss:$8 sps:$4 sm:$0xff]  }
  0x18   :  { %922 = vmatmul.mubr.msk.bf16.vlgmr.msra.gmra.mrb[0].mxu0 %vm123_vm0, %v1002_v3  ;;  %963 = vmatprep.subr.bf16.mxu1 %v1015_v7  ;;  %v1024_v14 = vld [vmem:[#allocation3 + $0x44] ss:$8 sps:$4 sm:$0xff]   ;;  %v1022_v15 = vld [vmem:[#allocation3 + $0x40] ss:$8 sps:$4 sm:$0xff]   ;;  %v1005_v16 = vld [vmem:[%s1413_s0 + $0x18] sm:$0xff]   ;;  %v1213_v45 = vsub.s32 0, %v1210_v44 }
  0x19   :  { %190 = vmatprep.mubr.bf16.mxu0 %v1109_v0  ;;  %514 = vmatpush1.bf16.msra.mxu0 %v1010_v5  ;;  %v1027_v17 = vld [vmem:[#allocation3 + $0x54] ss:$8 sps:$4 sm:$0xff]   ;;  %v1025_v18 = vld [vmem:[#allocation3 + $0x50] ss:$8 sps:$4 sm:$0xff]   ;;  %v1030_v19 = vld [vmem:[#allocation3 + $0x64] ss:$8 sps:$4 sm:$0xff]  }
  0x1a   :  { %515 = vmatprep.subr.bf16.mxu0 %v1015_v7  ;;  %v1028_v20 = vld [vmem:[#allocation3 + $0x60] ss:$8 sps:$4 sm:$0xff]   ;;  %v1033_v22 = vld [vmem:[#allocation3 + $0x74] ss:$8 sps:$4 sm:$0xff]   ;;  %v1031_v23 = vld [vmem:[#allocation3 + $0x70] ss:$8 sps:$4 sm:$0xff]  }
  0x1b   :  { %979 = vmatpush1.bf16.msra.mxu1 %v1013_v8  ;;  %v1006_v21 = vld [vmem:[%s1413_s0 + $0x20] sm:$0xff]   ;;  %v1007_v26 = vld [vmem:[%s1413_s0 + $0x28] sm:$0xff]   ;;  %v1039_v27 = vld [vmem:[#allocation3 + $0x94] ss:$8 sps:$4 sm:$0xff]   ;;  %v1219_v47 = vsub.s32 1, %v1210_v44  ;;  %vm809_vm3 = vcmask 261312  }
  0x1c   :  { %964 = vmatprep.subr.bf16.mxu1 %v1018_v9  ;;  %v1036_v24 = vld [vmem:[#allocation3 + $0x84] ss:$8 sps:$4 sm:$0xff]   ;;  %v1034_v25 = vld [vmem:[#allocation3 + $0x80] ss:$8 sps:$4 sm:$0xff]   ;;  %v1037_v28 = vld [vmem:[#allocation3 + $0x90] ss:$8 sps:$4 sm:$0xff]  }
  0x1d   :  { %516 = vmatpush1.bf16.msra.mxu0 %v1013_v8  ;;  %v1042_v29 = vld [vmem:[#allocation3 + $0xa4] ss:$8 sps:$4 sm:$0xff]   ;;  %v1040_v30 = vld [vmem:[#allocation3 + $0xa0] ss:$8 sps:$4 sm:$0xff]   ;;  %v1008_v31 = vld [vmem:[%s1413_s0 + $0x30] sm:$0xff]   ;;  %vm816_vm4 = vcmask 326912  }
  0x1e   :  { %517 = vmatprep.subr.bf16.mxu0 %v1018_v9  ;;  %v1045_v32 = vld [vmem:[#allocation3 + $0xb4] ss:$8 sps:$4 sm:$0xff]   ;;  %v1043_v33 = vld [vmem:[#allocation3 + $0xb0] ss:$8 sps:$4 sm:$0xff]   ;;  %v1048_v34 = vld [vmem:[#allocation3 + $0xc4] ss:$8 sps:$4 sm:$0xff]  }
  0x1f   :  { %980 = vmatpush1.bf16.msra.mxu1 %v1016_v10  ;;  %v1046_v35 = vld [vmem:[#allocation3 + $0xc0] ss:$8 sps:$4 sm:$0xff]   ;;  %v1009_v36 = vld [vmem:[%s1413_s0 + $0x38] sm:$0xff]   ;;  %v1054_v39 = vld [vmem:[#allocation3 + $0xe4] ss:$8 sps:$4 sm:$0xff]   ;;  %vm823_vm5 = vcmask 392512  }
  0x20   :  { %923 = vmatmul.mubr.msk.bf16.gmra.mrb[4].mxu0 %vm123_vm0, %v1003_v4  ;;  %965 = vmatprep.subr.bf16.mxu1 %v1021_v12  ;;  %v1051_v37 = vld [vmem:[#allocation3 + $0xd4] ss:$8 sps:$4 sm:$0xff]   ;;  %v1049_v38 = vld [vmem:[#allocation3 + $0xd0] ss:$8 sps:$4 sm:$0xff]   ;;  %v1052_v40 = vld [vmem:[#allocation3 + $0xe0] ss:$8 sps:$4 sm:$0xff]  }
  0x21   :  { %200 = vmatprep.mubr.bf16.mxu0 %v1109_v0  ;;  %518 = vmatpush1.bf16.msra.mxu0 %v1016_v10  ;;  %v1057_v41 = vld [vmem:[#allocation3 + $0xf4] ss:$8 sps:$4 sm:$0xff]   ;;  %v1055_v42 = vld [vmem:[#allocation3 + $0xf0] ss:$8 sps:$4 sm:$0xff]   ;;  %v61_v46 = vld [vmem:[%s1415_s2] sm:$0x3] }
  0x22   :  { %519 = vmatprep.subr.bf16.mxu0 %v1021_v12  ;;  %v1222_v48 = vrot.slane %v61_v46, %v1213_v45  ;;  %v1225_v49 = vrot.slane %v61_v46, %v1219_v47  ;;  %vm830_vm6 = vcmask 458112   ;;  %vm837_vm7 = vcmask 523712  }
  0x23   :  { %981 = vmatpush1.bf16.msra.mxu1 %v1019_v13  ;;  %vm844_vm8 = vcmask 589312   ;;  %vm851_vm9 = vcmask 654912   ;;  %vm858_vm10 = vcmask 720512   ;;  %vm865_vm11 = vcmask 786112  }
  0x24   :  { %966 = vmatprep.subr.bf16.mxu1 %v1024_v14  ;;  %vm872_vm12 = vcmask 851712   ;;  %vm879_vm13 = vcmask 917312   ;;  %vm886_vm14 = vcmask 982912   ;;  %vm893_vm15 = vcmask 1048512  }
  0x25   :  { %520 = vmatpush1.bf16.msra.mxu0 %v1019_v13 }
  0x26   :  { %521 = vmatprep.subr.bf16.mxu0 %v1024_v14 }
  0x27   :  { %982 = vmatpush1.bf16.msra.mxu1 %v1022_v15 }
  0x28   :  { %924 = vmatmul.mubr.msk.bf16.gmra.mrb[8].mxu0 %vm123_vm0, %v1004_v11  ;;  %967 = vmatprep.subr.bf16.mxu1 %v1027_v17 }
  0x29   :  { %210 = vmatprep.mubr.bf16.mxu0 %v1109_v0  ;;  %522 = vmatpush1.bf16.msra.mxu0 %v1022_v15 }
  0x2a   :  { %523 = vmatprep.subr.bf16.mxu0 %v1027_v17 }
  0x2b   :  { %983 = vmatpush1.bf16.msra.mxu1 %v1025_v18 }
  0x2c   :  { %968 = vmatprep.subr.bf16.mxu1 %v1030_v19 }
  0x2d   :  { %524 = vmatpush1.bf16.msra.mxu0 %v1025_v18 }
  0x2e   :  { %525 = vmatprep.subr.bf16.mxu0 %v1030_v19 }
  0x2f   :  { %984 = vmatpush1.bf16.msra.mxu1 %v1028_v20 }
  0x30   :  { %925 = vmatmul.mubr.msk.bf16.gmra.mrb[12].mxu0 %vm123_vm0, %v1005_v16  ;;  %969 = vmatprep.subr.bf16.mxu1 %v1033_v22 }
  0x31   :  { %220 = vmatprep.mubr.bf16.mxu0 %v1109_v0  ;;  %526 = vmatpush1.bf16.msra.mxu0 %v1028_v20 }
  0x32   :  { %527 = vmatprep.subr.bf16.mxu0 %v1033_v22 }
  0x33   :  { %985 = vmatpush1.bf16.msra.mxu1 %v1031_v23 }
  0x34   :  { %970 = vmatprep.subr.bf16.mxu1 %v1036_v24 }
  0x35   :  { %528 = vmatpush1.bf16.msra.mxu0 %v1031_v23 }
  0x36   :  { %529 = vmatprep.subr.bf16.mxu0 %v1036_v24 }
  0x37   :  { %986 = vmatpush1.bf16.msra.mxu1 %v1034_v25 }
  0x38   :  { %926 = vmatmul.mubr.msk.bf16.gmra.mrb[16].mxu0 %vm123_vm0, %v1006_v21  ;;  %971 = vmatprep.subr.bf16.mxu1 %v1039_v27 }
  0x39   :  { %230 = vmatprep.mubr.bf16.mxu0 %v1109_v0  ;;  %530 = vmatpush1.bf16.msra.mxu0 %v1034_v25 }
  0x3a   :  { %531 = vmatprep.subr.bf16.mxu0 %v1039_v27 }
  0x3b   :  { %987 = vmatpush1.bf16.msra.mxu1 %v1037_v28 }
  0x3c   :  { %972 = vmatprep.subr.bf16.mxu1 %v1042_v29 }
  0x3d   :  { %532 = vmatpush1.bf16.msra.mxu0 %v1037_v28 }
  0x3e   :  { %533 = vmatprep.subr.bf16.mxu0 %v1042_v29 }
  0x3f   :  { %988 = vmatpush1.bf16.msra.mxu1 %v1040_v30 }
  0x40   :  { %927 = vmatmul.mubr.msk.bf16.gmra.mrb[20].mxu0 %vm123_vm0, %v1007_v26  ;;  %973 = vmatprep.subr.bf16.mxu1 %v1045_v32 }
  0x41   :  { %240 = vmatprep.mubr.bf16.mxu0 %v1109_v0  ;;  %534 = vmatpush1.bf16.msra.mxu0 %v1040_v30 }
  0x42   :  { %535 = vmatprep.subr.bf16.mxu0 %v1045_v32 }
  0x43   :  { %989 = vmatpush1.bf16.msra.mxu1 %v1043_v33 }
  0x44   :  { %974 = vmatprep.subr.bf16.mxu1 %v1048_v34 }
  0x45   :  { %536 = vmatpush1.bf16.msra.mxu0 %v1043_v33 }
  0x46   :  { %537 = vmatprep.subr.bf16.mxu0 %v1048_v34 }
  0x47   :  { %990 = vmatpush1.bf16.msra.mxu1 %v1046_v35 }
  0x48   :  { %928 = vmatmul.mubr.msk.bf16.gmra.mrb[24].mxu0 %vm123_vm0, %v1008_v31  ;;  %975 = vmatprep.subr.bf16.mxu1 %v1051_v37 }
  0x49   :  { %250 = vmatprep.mubr.bf16.mxu0 %v1109_v0  ;;  %538 = vmatpush1.bf16.msra.mxu0 %v1046_v35 }
  0x4a   :  { %539 = vmatprep.subr.bf16.mxu0 %v1051_v37 }
  0x4b   :  { %991 = vmatpush1.bf16.msra.mxu1 %v1049_v38 }
  0x4c   :  { %976 = vmatprep.subr.bf16.mxu1 %v1054_v39 }
  0x4d   :  { %540 = vmatpush1.bf16.msra.mxu0 %v1049_v38 }
  0x4e   :  { %541 = vmatprep.subr.bf16.mxu0 %v1054_v39 }
  0x4f   :  { %992 = vmatpush1.bf16.msra.mxu1 %v1052_v40 }
  0x50   :  { %929 = vmatmul.mubr.msk.bf16.gmra.mrb[28].mxu0 %vm123_vm0, %v1009_v36  ;;  %977 = vmatprep.subr.bf16.mxu1 %v1057_v41 }
  0x51   :  { %542 = vmatpush1.bf16.msra.mxu0 %v1052_v40 }
  0x52   :  { %543 = vmatprep.subr.bf16.mxu0 %v1057_v41 }
  0x53   :  { %993 = vmatpush1.bf16.msra.mxu1 %v1055_v42 }
  0x55   :  { %544 = vmatpush1.bf16.msra.mxu0 %v1055_v42 }
  0xeb   :  { %v182_v50 = vpop.f32.mrb[0].mxu0 }
  0xec   :  { %v183_v51 = vadd.f32 %v182_v50, %v1222_v48  ;;  %v184_v52 = vpop.f32.mrb[1].mxu0 }
  0xed   :  { %v185_v53 = vadd.f32 %v184_v52, %v1225_v49  ;;  %v186_v54 = vpop.f32.mrb[2].mxu0 }
  0xee   :  { %v187_v55 = vadd.f32 %v186_v54, %v1222_v48  ;;  %v188_v56 = vpop.f32.mrb[3].mxu0  ;;  %v261_v58 = vmax.f32 %v183_v51, 0.0 }
  0xef   :  { %v189_v57 = vadd.f32 %v188_v56, %v1225_v49  ;;  %v262_v60 = vmax.f32 %v185_v53, 0.0 }
  0xf0   :  { %v263_v59 = vmax.f32 %v187_v55, 0.0 }
  0xf1   :  { %v264_v61 = vmax.f32 %v189_v57, 0.0 }
  0xf2   :  { %v293_v62 = vpack.c.bf16 %v263_v59, %v261_v58 }
  0xf3   :  { %v294_v63 = vpack.c.bf16 %v264_v61, %v262_v60  ;;  %v192_v0 = vpop.f32.mrb[4].mxu0 }
  0xf4   :  { %v193_v1 = vadd.f32 %v192_v0, %v1222_v48  ;;  %v194_v2 = vpop.f32.mrb[5].mxu0 }
  0xf5   :  { %v195_v3 = vadd.f32 %v194_v2, %v1225_v49  ;;  %v196_v4 = vpop.f32.mrb[6].mxu0  ;;  %545 = vmatprep.mubr.bf16.mxu0 %v294_v63 }
  0xf6   :  { %v197_v5 = vadd.f32 %v196_v4, %v1222_v48  ;;  %v198_v6 = vpop.f32.mrb[7].mxu0  ;;  %546 = vmatmul.mubr.bf16.vlgmr.msra.gmra.mrb[32].mxu0 %v293_v62  ;;  %v265_v8 = vmax.f32 %v193_v1, 0.0 }
  0xf7   :  { %v199_v7 = vadd.f32 %v198_v6, %v1225_v49  ;;  %v266_v10 = vmax.f32 %v195_v3, 0.0 }
  0xf8   :  { %v267_v9 = vmax.f32 %v197_v5, 0.0 }
  0xf9   :  { %v268_v11 = vmax.f32 %v199_v7, 0.0 }
  0xfa   :  { %v295_v12 = vpack.c.bf16 %v267_v9, %v265_v8 }
  0xfb   :  { %v296_v13 = vpack.c.bf16 %v268_v11, %v266_v10  ;;  %v202_v14 = vpop.f32.mrb[8].mxu0 }
  0xfc   :  { %v203_v15 = vadd.f32 %v202_v14, %v1222_v48  ;;  %v204_v16 = vpop.f32.mrb[9].mxu0 }
  0xfd   :  { %v205_v17 = vadd.f32 %v204_v16, %v1225_v49  ;;  %v206_v18 = vpop.f32.mrb[10].mxu0  ;;  %555 = vmatprep.mubr.bf16.mxu0 %v296_v13 }
  0xfe   :  { %v207_v19 = vadd.f32 %v206_v18, %v1222_v48  ;;  %v208_v20 = vpop.f32.mrb[11].mxu0  ;;  %556 = vmatmul.mubr.bf16.gmra.mrb[36].mxu0 %v295_v12  ;;  %v269_v22 = vmax.f32 %v203_v15, 0.0 }
  0xff   :  { %v209_v21 = vadd.f32 %v208_v20, %v1225_v49  ;;  %v270_v24 = vmax.f32 %v205_v17, 0.0 }
 0x100   :  { %v271_v23 = vmax.f32 %v207_v19, 0.0 }
 0x101   :  { %v272_v25 = vmax.f32 %v209_v21, 0.0 }
 0x102   :  { %v297_v26 = vpack.c.bf16 %v271_v23, %v269_v22 }
 0x103   :  { %v298_v27 = vpack.c.bf16 %v272_v25, %v270_v24  ;;  %v212_v28 = vpop.f32.mrb[12].mxu0 }
 0x104   :  { %v213_v29 = vadd.f32 %v212_v28, %v1222_v48  ;;  %v214_v30 = vpop.f32.mrb[13].mxu0 }
 0x105   :  { %v215_v31 = vadd.f32 %v214_v30, %v1225_v49  ;;  %v216_v32 = vpop.f32.mrb[14].mxu0  ;;  %565 = vmatprep.mubr.bf16.mxu0 %v298_v27 }
 0x106   :  { %v217_v33 = vadd.f32 %v216_v32, %v1222_v48  ;;  %v218_v34 = vpop.f32.mrb[15].mxu0  ;;  %566 = vmatmul.mubr.bf16.gmra.mrb[40].mxu0 %v297_v26  ;;  %v273_v36 = vmax.f32 %v213_v29, 0.0 }
 0x107   :  { %v219_v35 = vadd.f32 %v218_v34, %v1225_v49  ;;  %v274_v38 = vmax.f32 %v215_v31, 0.0 }
 0x108   :  { %v275_v37 = vmax.f32 %v217_v33, 0.0 }
 0x109   :  { %v276_v39 = vmax.f32 %v219_v35, 0.0 }
 0x10a   :  { %v299_v40 = vpack.c.bf16 %v275_v37, %v273_v36 }
 0x10b   :  { %v222_v41 = vpop.f32.mrb[16].mxu0  ;;  %v300_v42 = vpack.c.bf16 %v276_v39, %v274_v38 }
 0x10c   :  { %v223_v46 = vadd.f32 %v222_v41, %v1222_v48  ;;  %v224_v50 = vpop.f32.mrb[17].mxu0 }
 0x10d   :  { %v225_v51 = vadd.f32 %v224_v50, %v1225_v49  ;;  %v226_v52 = vpop.f32.mrb[18].mxu0  ;;  %575 = vmatprep.mubr.bf16.mxu1 %v300_v42 }
 0x10e   :  { %v227_v53 = vadd.f32 %v226_v52, %v1222_v48  ;;  %v228_v54 = vpop.f32.mrb[19].mxu0  ;;  %576 = vmatmul.mubr.bf16.vlgmr.msra.gmra.mrb[0].mxu1 %v299_v40  ;;  %v277_v56 = vmax.f32 %v223_v46, 0.0  ;;  %v341_v40 = vld [vmem:[%s1417_s4] sm:$0x3] }
 0x10f   :  { %v229_v55 = vadd.f32 %v228_v54, %v1225_v49  ;;  %v278_v58 = vmax.f32 %v225_v51, 0.0  ;;  %v1263_v41 = vrot.slane %v341_v40, %v1213_v45 }
 0x110   :  { %v279_v57 = vmax.f32 %v227_v53, 0.0 }
 0x111   :  { %v280_v59 = vmax.f32 %v229_v55, 0.0 }
 0x112   :  { %v301_v60 = vpack.c.bf16 %v279_v57, %v277_v56 }
 0x113   :  { %v302_v61 = vpack.c.bf16 %v280_v59, %v278_v58  ;;  %v232_v62 = vpop.f32.mrb[20].mxu0 }
 0x114   :  { %v233_v63 = vadd.f32 %v232_v62, %v1222_v48  ;;  %v234_v0 = vpop.f32.mrb[21].mxu0 }
 0x115   :  { %v235_v1 = vadd.f32 %v234_v0, %v1225_v49  ;;  %v236_v2 = vpop.f32.mrb[22].mxu0  ;;  %585 = vmatprep.mubr.bf16.mxu1 %v302_v61 }
 0x116   :  { %v237_v3 = vadd.f32 %v236_v2, %v1222_v48  ;;  %v238_v4 = vpop.f32.mrb[23].mxu0  ;;  %586 = vmatmul.mubr.bf16.gmra.mrb[4].mxu1 %v301_v60  ;;  %v281_v6 = vmax.f32 %v233_v63, 0.0 }
 0x117   :  { %v239_v5 = vadd.f32 %v238_v4, %v1225_v49  ;;  %v282_v8 = vmax.f32 %v235_v1, 0.0 }
 0x118   :  { %v283_v7 = vmax.f32 %v237_v3, 0.0 }
 0x119   :  { %v284_v9 = vmax.f32 %v239_v5, 0.0 }
 0x11a   :  { %v303_v10 = vpack.c.bf16 %v283_v7, %v281_v6 }
 0x11b   :  { %v304_v11 = vpack.c.bf16 %v284_v9, %v282_v8  ;;  %v242_v12 = vpop.f32.mrb[24].mxu0 }
 0x11c   :  { %v243_v13 = vadd.f32 %v242_v12, %v1222_v48  ;;  %v244_v14 = vpop.f32.mrb[25].mxu0 }
 0x11d   :  { %v245_v15 = vadd.f32 %v244_v14, %v1225_v49  ;;  %v246_v16 = vpop.f32.mrb[26].mxu0  ;;  %595 = vmatprep.mubr.bf16.mxu1 %v304_v11 }
 0x11e   :  { %v247_v17 = vadd.f32 %v246_v16, %v1222_v48  ;;  %v248_v18 = vpop.f32.mrb[27].mxu0  ;;  %596 = vmatmul.mubr.bf16.gmra.mrb[8].mxu1 %v303_v10  ;;  %v285_v20 = vmax.f32 %v243_v13, 0.0 }
 0x11f   :  { %v249_v19 = vadd.f32 %v248_v18, %v1225_v49  ;;  %v286_v22 = vmax.f32 %v245_v15, 0.0 }
 0x120   :  { %v287_v21 = vmax.f32 %v247_v17, 0.0 }
 0x121   :  { %v288_v23 = vmax.f32 %v249_v19, 0.0 }
 0x122   :  { %v305_v24 = vpack.c.bf16 %v287_v21, %v285_v20 }
 0x123   :  { %v306_v25 = vpack.c.bf16 %v288_v23, %v286_v22  ;;  %v252_v26 = vpop.f32.mrb[28].mxu0 }
 0x124   :  { %v253_v27 = vadd.f32 %v252_v26, %v1222_v48  ;;  %v254_v28 = vpop.f32.mrb[29].mxu0 }
 0x125   :  { %v255_v29 = vadd.f32 %v254_v28, %v1225_v49  ;;  %v256_v30 = vpop.f32.mrb[30].mxu0  ;;  %605 = vmatprep.mubr.bf16.mxu1 %v306_v25 }
 0x126   :  { %v257_v31 = vadd.f32 %v256_v30, %v1222_v48  ;;  %v258_v32 = vpop.f32.mrb[31].mxu0  ;;  %606 = vmatmul.mubr.bf16.gmra.mrb[12].mxu1 %v305_v24  ;;  %v289_v34 = vmax.f32 %v253_v27, 0.0  ;;  %v1266_v48 = vrot.slane %v341_v40, %v1219_v47 }
 0x127   :  { %v259_v33 = vadd.f32 %v258_v32, %v1225_v49  ;;  %v290_v36 = vmax.f32 %v255_v29, 0.0  ;;  %v658_v49 = vld [vmem:[%s1418_s5] sm:$0x3] }
 0x128   :  { %v291_v35 = vmax.f32 %v257_v31, 0.0  ;;  %v1273_v51 = vrot.slane %v658_v49, %v1213_v45  ;;  %v1277_v54 = vrot.slane %v658_v49, %v1219_v47 }
 0x129   :  { %v292_v37 = vmax.f32 %v259_v33, 0.0 }
 0x12a   :  { %v307_v38 = vpack.c.bf16 %v291_v35, %v289_v34 }
 0x12b   :  { %v308_v39 = vpack.c.bf16 %v292_v37, %v290_v36 }
 0x12d   :  { %615 = vmatprep.mubr.bf16.mxu1 %v308_v39 }
 0x12e   :  { %616 = vmatmul.mubr.bf16.gmra.mrb[16].mxu1 %v307_v38 }
 0x1c9   :  { %v547_v42 = vpop.f32.mrb[32].mxu0 }
 0x1ca   :  { %v548_v46 = vadd.f32 %v547_v42, %v1263_v41  ;;  %v549_v50 = vpop.f32.mrb[33].mxu0 }
 0x1cb   :  { %v550_v52 = vadd.f32 %v549_v50, %v1266_v48  ;;  %v551_v53 = vpop.f32.mrb[34].mxu0 }
 0x1cc   :  { %v626_v55 = vmax.f32 %v548_v46, 0.0  ;;  %v552_v56 = vadd.f32 %v551_v53, %v1263_v41  ;;  %v553_v57 = vpop.f32.mrb[35].mxu0 }
 0x1cd   :  { %v627_v58 = vmax.f32 %v550_v52, 0.0  ;;  %v554_v59 = vadd.f32 %v553_v57, %v1266_v48 }
 0x1ce   :  { %v628_v60 = vmax.f32 %v552_v56, 0.0  ;;  %v670_v61 = vmul.f32 %v1273_v51, %v626_v55 }
 0x1cf   :  { %v629_v62 = vmax.f32 %v554_v59, 0.0  ;;  %v671_v45 = vmul.f32 %v1277_v54, %v627_v58 }
 0x1d0   :  { %v672_v63 = vmul.f32 %v1273_v51, %v628_v60 }
 0x1d1   :  { %v673_v0 = vmul.f32 %v1277_v54, %v629_v62  ;;  %v557_v1 = vpop.f32.mrb[36].mxu0  ;;  %v702_v47 = vadd.f32 %v671_v45, %v670_v61 }
 0x1d2   :  { %v558_v2 = vadd.f32 %v557_v1, %v1263_v41  ;;  %v559_v3 = vpop.f32.mrb[37].mxu0 }
 0x1d3   :  { %v560_v4 = vadd.f32 %v559_v3, %v1266_v48  ;;  %v561_v5 = vpop.f32.mrb[38].mxu0  ;;  %703 = vadd.xlane.f32.xlu0 %v702_v47  ;;  %v705_v6 = vadd.f32 %v673_v0, %v672_v63 }
 0x1d4   :  { %v630_v7 = vmax.f32 %v558_v2, 0.0  ;;  %v562_v8 = vadd.f32 %v561_v5, %v1263_v41  ;;  %v563_v9 = vpop.f32.mrb[39].mxu0 }
 0x1d5   :  { %v631_v10 = vmax.f32 %v560_v4, 0.0  ;;  %v564_v11 = vadd.f32 %v563_v9, %v1266_v48 }
 0x1d6   :  { %v632_v12 = vmax.f32 %v562_v8, 0.0  ;;  %v674_v13 = vmul.f32 %v1273_v51, %v630_v7 }
 0x1d7   :  { %v633_v14 = vmax.f32 %v564_v11, 0.0  ;;  %706 = vadd.xlane.f32.xlu0 %v705_v6  ;;  %v675_v15 = vmul.f32 %v1277_v54, %v631_v10 }
 0x1d8   :  { %v676_v16 = vmul.f32 %v1273_v51, %v632_v12 }
 0x1d9   :  { %v677_v17 = vmul.f32 %v1277_v54, %v633_v14  ;;  %v567_v18 = vpop.f32.mrb[40].mxu0  ;;  %v708_v19 = vadd.f32 %v675_v15, %v674_v13 }
 0x1da   :  { %v568_v20 = vadd.f32 %v567_v18, %v1263_v41  ;;  %v569_v21 = vpop.f32.mrb[41].mxu0 }
 0x1db   :  { %v570_v22 = vadd.f32 %v569_v21, %v1266_v48  ;;  %v571_v23 = vpop.f32.mrb[42].mxu0  ;;  %709 = vadd.xlane.f32.xlu1 %v708_v19  ;;  %v711_v24 = vadd.f32 %v677_v17, %v676_v16 }
 0x1dc   :  { %v634_v25 = vmax.f32 %v568_v20, 0.0  ;;  %v572_v26 = vadd.f32 %v571_v23, %v1263_v41  ;;  %v573_v27 = vpop.f32.mrb[43].mxu0 }
 0x1dd   :  { %v635_v28 = vmax.f32 %v570_v22, 0.0  ;;  %v574_v29 = vadd.f32 %v573_v27, %v1266_v48 }
 0x1de   :  { %v678_v30 = vmul.f32 %v1273_v51, %v634_v25  ;;  %v636_v31 = vmax.f32 %v572_v26, 0.0 }
 0x1df   :  { %v679_v32 = vmul.f32 %v1277_v54, %v635_v28  ;;  %v637_v33 = vmax.f32 %v574_v29, 0.0  ;;  %712 = vadd.xlane.f32.xlu1 %v711_v24 }
 0x1e0   :  { %v680_v34 = vmul.f32 %v1273_v51, %v636_v31 }
 0x1e1   :  { %v681_v35 = vmul.f32 %v1277_v54, %v637_v33  ;;  %v577_v36 = vpop.f32.mrb[0].mxu1  ;;  %v714_v37 = vadd.f32 %v679_v32, %v678_v30 }
 0x1e2   :  { %v578_v38 = vadd.f32 %v577_v36, %v1263_v41  ;;  %v579_v39 = vpop.f32.mrb[1].mxu1 }
 0x1e3   :  { %v580_v40 = vadd.f32 %v579_v39, %v1266_v48  ;;  %v581_v49 = vpop.f32.mrb[2].mxu1  ;;  %715 = vadd.xlane.f32.xlu0 %v714_v37  ;;  %v717_v42 = vadd.f32 %v681_v35, %v680_v34 }
 0x1e4   :  { %v638_v46 = vmax.f32 %v578_v38, 0.0  ;;  %v582_v50 = vadd.f32 %v581_v49, %v1263_v41  ;;  %v583_v52 = vpop.f32.mrb[3].mxu1 }
 0x1e5   :  { %v639_v53 = vmax.f32 %v580_v40, 0.0  ;;  %v584_v55 = vadd.f32 %v583_v52, %v1266_v48  ;;  %718 = vadd.xlane.f32.xlu1 %v717_v42 }
 0x1e6   :  { %v682_v56 = vmul.f32 %v1273_v51, %v638_v46  ;;  %v640_v57 = vmax.f32 %v582_v50, 0.0 }
 0x1e7   :  { %v683_v58 = vmul.f32 %v1277_v54, %v639_v53  ;;  %v641_v59 = vmax.f32 %v584_v55, 0.0 }
 0x1e8   :  { %v684_v60 = vmul.f32 %v1273_v51, %v640_v57 }
 0x1e9   :  { %v685_v61 = vmul.f32 %v1277_v54, %v641_v59  ;;  %v587_v62 = vpop.f32.mrb[4].mxu1  ;;  %v720_v45 = vadd.f32 %v683_v58, %v682_v56 }
 0x1ea   :  { %v588_v63 = vadd.f32 %v587_v62, %v1263_v41  ;;  %v589_v0 = vpop.f32.mrb[5].mxu1 }
 0x1eb   :  { %v590_v1 = vadd.f32 %v589_v0, %v1266_v48  ;;  %v591_v47 = vpop.f32.mrb[6].mxu1  ;;  %721 = vadd.xlane.f32.xlu0 %v720_v45  ;;  %v723_v2 = vadd.f32 %v685_v61, %v684_v60 }
 0x1ec   :  { %v642_v3 = vmax.f32 %v588_v63, 0.0  ;;  %v592_v4 = vadd.f32 %v591_v47, %v1263_v41  ;;  %v593_v5 = vpop.f32.mrb[7].mxu1 }
 0x1ed   :  { %v643_v6 = vmax.f32 %v590_v1, 0.0  ;;  %v594_v7 = vadd.f32 %v593_v5, %v1266_v48  ;;  %724 = vadd.xlane.f32.xlu1 %v723_v2 }
 0x1ee   :  { %v686_v8 = vmul.f32 %v1273_v51, %v642_v3  ;;  %v644_v9 = vmax.f32 %v592_v4, 0.0 }
 0x1ef   :  { %v687_v10 = vmul.f32 %v1277_v54, %v643_v6  ;;  %v645_v11 = vmax.f32 %v594_v7, 0.0 }
 0x1f0   :  { %v688_v12 = vmul.f32 %v1273_v51, %v644_v9 }
 0x1f1   :  { %v689_v13 = vmul.f32 %v1277_v54, %v645_v11  ;;  %v597_v14 = vpop.f32.mrb[8].mxu1  ;;  %v726_v15 = vadd.f32 %v687_v10, %v686_v8 }
 0x1f2   :  { %v598_v16 = vadd.f32 %v597_v14, %v1263_v41  ;;  %v599_v17 = vpop.f32.mrb[9].mxu1 }
 0x1f3   :  { %v600_v18 = vadd.f32 %v599_v17, %v1266_v48  ;;  %v601_v19 = vpop.f32.mrb[10].mxu1  ;;  %727 = vadd.xlane.f32.xlu0 %v726_v15  ;;  %v729_v20 = vadd.f32 %v689_v13, %v688_v12  ;;  %v1342_v13 = vand.u32 127, %v63_v43 }
 0x1f4   :  { %v646_v21 = vmax.f32 %v598_v16, 0.0  ;;  %v602_v22 = vadd.f32 %v601_v19, %v1263_v41  ;;  %v603_v23 = vpop.f32.mrb[11].mxu1 }
 0x1f5   :  { %v647_v24 = vmax.f32 %v600_v18, 0.0  ;;  %v604_v25 = vadd.f32 %v603_v23, %v1266_v48  ;;  %730 = vadd.xlane.f32.xlu1 %v729_v20  ;;  %v797_v15 = vadd.s32 4294967280, %v1342_v13  ;;  %v804_v16 = vadd.s32 4294967272, %v1342_v13 }
 0x1f6   :  { %v690_v26 = vmul.f32 %v1273_v51, %v646_v21  ;;  %v648_v27 = vmax.f32 %v602_v22, 0.0  ;;  %v811_v17 = vadd.s32 4294967264, %v1342_v13  ;;  %v788_v20 = vsub.s32 %v1342_v13, %v1210_v44 }
 0x1f7   :  { %v691_v28 = vmul.f32 %v1277_v54, %v647_v24  ;;  %v649_v29 = vmax.f32 %v604_v25, 0.0  ;;  %v800_v21 = vsub.s32 %v797_v15, %v1210_v44  ;;  %v807_v24 = vsub.s32 %v804_v16, %v1210_v44 }
 0x1f8   :  { %v692_v30 = vmul.f32 %v1273_v51, %v648_v27  ;;  %v814_v27 = vsub.s32 %v811_v17, %v1210_v44  ;;  %v874_v16 = vadd.s32 4294967192, %v1342_v13 }
 0x1f9   :  { %v693_v31 = vmul.f32 %v1277_v54, %v649_v29  ;;  %v607_v32 = vpop.f32.mrb[12].mxu1  ;;  %v732_v33 = vadd.f32 %v691_v28, %v690_v26  ;;  %v818_v26 = vadd.s32 4294967256, %v1342_v13 }
 0x1fa   :  { %v608_v34 = vadd.f32 %v607_v32, %v1263_v41  ;;  %v609_v35 = vpop.f32.mrb[13].mxu1 }
 0x1fb   :  { %v610_v36 = vadd.f32 %v609_v35, %v1266_v48  ;;  %v611_v37 = vpop.f32.mrb[14].mxu1  ;;  %733 = vadd.xlane.f32.xlu0 %v732_v33  ;;  %v735_v38 = vadd.f32 %v693_v31, %v692_v30  ;;  %v825_v30 = vadd.s32 4294967248, %v1342_v13 }
 0x1fc   :  { %v650_v39 = vmax.f32 %v608_v34, 0.0  ;;  %v612_v40 = vadd.f32 %v611_v37, %v1263_v41  ;;  %v613_v49 = vpop.f32.mrb[15].mxu1  ;;  %v832_v34 = vadd.s32 4294967240, %v1342_v13  ;;  %v821_v37 = vsub.s32 %v818_v26, %v1210_v44 }
 0x1fd   :  { %v651_v42 = vmax.f32 %v610_v36, 0.0  ;;  %v614_v46 = vadd.f32 %v613_v49, %v1266_v48  ;;  %736 = vadd.xlane.f32.xlu1 %v735_v38 }
 0x1fe   :  { %v694_v50 = vmul.f32 %v1273_v51, %v650_v39  ;;  %v652_v52 = vmax.f32 %v612_v40, 0.0  ;;  %v828_v40 = vsub.s32 %v825_v30, %v1210_v44 }
 0x1ff   :  { %v695_v53 = vmul.f32 %v1277_v54, %v651_v42  ;;  %v653_v55 = vmax.f32 %v614_v46, 0.0  ;;  %v839_v46 = vadd.s32 4294967232, %v1342_v13 }
 0x200   :  { %v696_v56 = vmul.f32 %v1273_v51, %v652_v52 }
 0x201   :  { %v697_v57 = vmul.f32 %v1277_v54, %v653_v55  ;;  %v617_v58 = vpop.f32.mrb[16].mxu1  ;;  %v738_v59 = vadd.f32 %v695_v53, %v694_v50  ;;  %v835_v55 = vsub.s32 %v832_v34, %v1210_v44 }
 0x202   :  { %v618_v60 = vadd.f32 %v617_v58, %v1263_v41  ;;  %v619_v61 = vpop.f32.mrb[17].mxu1 }
 0x203   :  { %v620_v62 = vadd.f32 %v619_v61, %v1266_v48  ;;  %v621_v45 = vpop.f32.mrb[18].mxu1  ;;  %739 = vadd.xlane.f32.xlu0 %v738_v59  ;;  %v741_v63 = vadd.f32 %v697_v57, %v696_v56  ;;  %v846_v56 = vadd.s32 4294967224, %v1342_v13 }
 0x204   :  { %v654_v0 = vmax.f32 %v618_v60, 0.0  ;;  %v622_v1 = vadd.f32 %v621_v45, %v1263_v41  ;;  %v623_v47 = vpop.f32.mrb[19].mxu1  ;;  %v853_v60 = vadd.s32 4294967216, %v1342_v13  ;;  %v842_v45 = vsub.s32 %v839_v46, %v1210_v44 }
 0x205   :  { %v655_v2 = vmax.f32 %v620_v62, 0.0  ;;  %v624_v3 = vadd.f32 %v623_v47, %v1266_v48  ;;  %742 = vadd.xlane.f32.xlu1 %v741_v63  ;;  %v790_v48 = vadd.s32 4294967288, %v1342_v13  ;;  %v849_v47 = vsub.s32 %v846_v56, %v1210_v44 }
 0x206   :  { %v698_v4 = vmul.f32 %v1273_v51, %v654_v0  ;;  %v656_v5 = vmax.f32 %v622_v1, 0.0 }
 0x207   :  { %v699_v6 = vmul.f32 %v1277_v54, %v655_v2  ;;  %v657_v7 = vmax.f32 %v624_v3, 0.0  ;;  %v793_v18 = vsub.s32 %v790_v48, %v1210_v44  ;;  %v860_v2 = vadd.s32 4294967208, %v1342_v13 }
 0x208   :  { %v700_v8 = vmul.f32 %v1273_v51, %v656_v5  ;;  %v1350_v51 = vstv %s1419_s6  ;;  %s1110_s6 = smov [#allocation6]  }
 0x209   :  { %v701_v9 = vmul.f32 %v1277_v54, %v657_v7  ;;  %v744_v10 = vadd.f32 %v699_v6, %v698_v4  ;;  %v856_v6 = vsub.s32 %v853_v60, %v1210_v44  ;;  %s903_s14 = sshll.u32 %s1110_s6, 4  ;;  %s904_s14 = int_to_ptr.vmem [resolvable:$true] %s903_s14 }
 0x20a   :  { %s1080_s15 = scalar_lea.vmem %s904_s14, 16  ;;  %s1084_s16 = scalar_lea.vmem %s904_s14, 32 }
 0x20b   :  { %745 = vadd.xlane.f32.xlu0 %v744_v10  ;;  %v747_v11 = vadd.f32 %v701_v9, %v700_v8  ;;  %p1081_p8 = scmp.ne.s32.totalorder %s904_s14, %s1080_s15  ;;  %p1085_p9 = scmp.lt.s32.totalorder %s904_s14, %s904_s14 }
 0x20c   :  { %p1086_p10 = scmp.lt.s32.totalorder %s1084_s16, %s1080_s15 }
 0x20d   :  { %748 = vadd.xlane.f32.xlu1 %v747_v11  ;;  %v867_v11 = vadd.s32 4294967200, %v1342_v13 }
 0x20e   :  { %p1087_p11 = por %p1086_p10, %p1085_p9 }
 0x210   :  { %p1088_p12 = pnand %p1087_p11, %p1081_p8 }
 0x260   :  { %v704_v41 = vpop.xlane.xlu0 %703 }
 0x261   :  { %v752_v23 = vadd.f32 %v1350_v51, %v704_v41  ;;  %v863_v41 = vsub.s32 %v860_v2, %v1210_v44 }
 0x263   :  { %v789_v35 = vrot.slane %v752_v23, %v788_v20  ;;  %v881_v20 = vadd.s32 4294967184, %v1342_v13  ;;  %v877_v23 = vsub.s32 %v874_v16, %v1210_v44 }
 0x264   :  { %v707_v14 = vpop.xlane.xlu0 %706 }
 0x265   :  { %v753_v43 = vadd.f32 %v1350_v51, %v707_v14 }
 0x267   :  { %v794_v31 = vrot.slane %v753_v43, %v793_v18  ;;  %v870_v18 = vsub.s32 %v867_v11, %v1210_v44 }
 0x268   :  { %v710_v12 = vpop.xlane.xlu1 %709 }
 0x269   :  { %v754_v22 = vadd.f32 %v1350_v51, %v710_v12  ;;  %v796_v50 = vsel %vm795_vm1, %v794_v31, %v789_v35 }
 0x26b   :  { %v801_v33 = vrot.slane %v754_v22, %v800_v21 }
 0x26c   :  { %v713_v54 = vpop.xlane.xlu1 %712 }
 0x26d   :  { %v755_v25 = vadd.f32 %v1350_v51, %v713_v54  ;;  %v803_v53 = vsel %vm802_vm2, %v801_v33, %v796_v50 }
 0x26f   :  { %v808_v36 = vrot.slane %v755_v25, %v807_v24 }
 0x270   :  { %v716_v19 = vpop.xlane.xlu0 %715 }
 0x271   :  { %v756_v28 = vadd.f32 %v1350_v51, %v716_v19  ;;  %v810_v57 = vsel %vm809_vm3, %v808_v36, %v803_v53 }
 0x272   :  { %v719_v29 = vpop.xlane.xlu1 %718 }
 0x273   :  { %v757_v38 = vadd.f32 %v1350_v51, %v719_v29  ;;  %v815_v39 = vrot.slane %v756_v28, %v814_v27  ;;  %v888_v27 = vadd.s32 4294967176, %v1342_v13  ;;  %v884_v28 = vsub.s32 %v881_v20, %v1210_v44 }
 0x275   :  { %v822_v58 = vrot.slane %v757_v38, %v821_v37  ;;  %v817_v61 = vsel %vm816_vm4, %v815_v39, %v810_v57  ;;  %v891_v34 = vsub.s32 %v888_v27, %v1210_v44 }
 0x277   :  { %v824_v3 = vsel %vm823_vm5, %v822_v58, %v817_v61 }
 0x278   :  { %v722_v32 = vpop.xlane.xlu0 %721 }
 0x279   :  { %v758_v49 = vadd.f32 %v1350_v51, %v722_v32 }
 0x27a   :  { %v725_v42 = vpop.xlane.xlu1 %724 }
 0x27b   :  { %v759_v59 = vadd.f32 %v1350_v51, %v725_v42  ;;  %v829_v62 = vrot.slane %v758_v49, %v828_v40 }
 0x27d   :  { %v836_v4 = vrot.slane %v759_v59, %v835_v55  ;;  %v831_v7 = vsel %vm830_vm6, %v829_v62, %v824_v3 }
 0x27f   :  { %v838_v12 = vsel %vm837_vm7, %v836_v4, %v831_v7 }
 0x280   :  { %v728_v52 = vpop.xlane.xlu0 %727 }
 0x281   :  { %v760_v63 = vadd.f32 %v1350_v51, %v728_v52 }
 0x282   :  { %v731_v0 = vpop.xlane.xlu1 %730 }
 0x283   :  { %v761_v5 = vadd.f32 %v1350_v51, %v731_v0  ;;  %v843_v8 = vrot.slane %v760_v63, %v842_v45 }
 0x285   :  { %v850_v48 = vrot.slane %v761_v5, %v849_v47  ;;  %v845_v54 = vsel %vm844_vm8, %v843_v8, %v838_v12 }
 0x287   :  { %v852_v21 = vsel %vm851_vm9, %v850_v48, %v845_v54 }
 0x288   :  { %v734_v1 = vpop.xlane.xlu0 %733 }
 0x289   :  { %v762_v9 = vadd.f32 %v1350_v51, %v734_v1 }
 0x28a   :  { %v737_v10 = vpop.xlane.xlu1 %736 }
 0x28b   :  { %v763_v14 = vadd.f32 %v1350_v51, %v737_v10  ;;  %v857_v17 = vrot.slane %v762_v9, %v856_v6 }
 0x28d   :  { %v864_v22 = vrot.slane %v763_v14, %v863_v41  ;;  %v859_v25 = vsel %vm858_vm10, %v857_v17, %v852_v21 }
 0x28f   :  { %v866_v29 = vsel %vm865_vm11, %v864_v22, %v859_v25 }
 0x290   :  { %v740_v15 = vpop.xlane.xlu0 %739 }
 0x291   :  { %v764_v43 = vadd.f32 %v1350_v51, %v740_v15 }
 0x292   :  { %v743_v19 = vpop.xlane.xlu1 %742 }
 0x293   :  { %v765_v24 = vadd.f32 %v1350_v51, %v743_v19  ;;  %v871_v26 = vrot.slane %v764_v43, %v870_v18 }
 0x295   :  { %v878_v30 = vrot.slane %v765_v24, %v877_v23  ;;  %v873_v32 = vsel %vm872_vm12, %v871_v26, %v866_v29 }
 0x297   :  { %v880_v13 = vsel %vm879_vm13, %v878_v30, %v873_v32 }
 0x298   :  { %v746_v31 = vpop.xlane.xlu0 %745 }
 0x299   :  { %v766_v33 = vadd.f32 %v1350_v51, %v746_v31 }
 0x29a   :  { %v749_v35 = vpop.xlane.xlu1 %748 }
 0x29b   :  { %v885_v36 = vrot.slane %v766_v33, %v884_v28  ;;  %v767_v37 = vadd.f32 %v1350_v51, %v749_v35 }
 0x29d   :  { %v892_v38 = vrot.slane %v767_v37, %v891_v34  ;;  %v887_v39 = vsel %vm886_vm14, %v885_v36, %v880_v13 }
 0x29f   :  { %v894_v40 = vsel %vm893_vm15, %v892_v38, %v887_v39 }
 0x2a0   :  { %896 = vst [vmem:[#allocation6] sm:$0x1] %v894_v40 }
 0x2a1   :  { %1091 = shalt.err (!%p1088_p12)
}
 0x2a2   :  { %s1092_s19 = scalar_lea.hbm %s1420_s7, 16 }
 0x2a3   :  { %p1093_p13 = scmp.ne.s32.totalorder %s1420_s7, %s1092_s19  ;;  %p1096_p0 = scmp.lt.u32.totalorder %s1092_s19, %s1420_s7 }
 0x2a5   :  { %p1098_p1 = pnand %p1096_p0, %p1093_p13 }
 0x2a7   :  { %1101 = shalt.err (!%p1098_p1)
}
 0x2a8   :  { %906 = dma.vmem_to_hbm [thread:$0]  %s904_s14, 16, %s1420_s7, [#allocation5]  }
 0x2a9   :  { %1104 = dma.done.wait [#allocation5], 16  }
 0x2aa   :  { %1105 = vsyncadd [#allocation5], 4294967280 }
 0x2ab   :  { %910 = vsyncpa [#allocation4], 1 }
 0x2ac   :  { %911 = vsyncpa [#allocation5], 1 }

</bundles_post_ra>
